<compile_context>
chip_gen: v5e
topology: v5e:2x2
jax: 0.10.0
libtpu: 0.0.40
codegen_flags: <defaults>
</compile_context>

<pallas_src>
import jax
import jax.numpy as jnp
import numpy as np
from jax.experimental import pallas as pl
from jax.experimental.pallas import tpu as pltpu


def _make_gemnet_kernel(A, R, Rpad, Bt):
    inv_R = float(1.0 / R)

    def kernel(feat_ref, lhs_ref, bv_ref, v2s_ref, att_v2s_ref, amap_ref):
        # feat_ref: [Bt, C, Rpad] bf16   lhs_ref: [2A, C] bf16   bv_ref: [1, A] f32
        lhs = lhs_ref[...]                                        # hoisted out of loop
        bias = bv_ref[0, :]                                       # [A] f32
        if Rpad != R:
            col = jax.lax.broadcasted_iota(jnp.int32, (1, Rpad), 1)
            valid = col < R                                       # [1, Rpad]

        for b in range(Bt):                                       # static unroll, Bt <= 8
            # Single fused MXU pass: attention logits + V projections.
            scores = jnp.dot(lhs, feat_ref[b],
                             preferred_element_type=jnp.float32)  # [2A, Rpad] f32
            att_s = scores[:A, :]                                 # attention logits
            base_s = scores[A:, :]                                # V(feat) per position

            # attentionModule: softmax over the (padded) spatial axis.
            if Rpad != R:
                att_s = jnp.where(valid, att_s, -jnp.inf)
            m = jnp.max(att_s, axis=-1, keepdims=True)            # [A, 1]
            p = jnp.exp(att_s - m)                                # pad cols -> 0, row max == 1
            denom = jnp.sum(p, axis=-1, keepdims=True)            # [A, 1]
            inv = 1.0 / denom                                     # exact reciprocal
            amap_ref[b] = p * inv

            # F.max_pool2d over (W, H) of the softmax == 1/denom (row max of p is 1).
            att_v2s_ref[b, :] = inv[:, 0]

            # base_module: avg_pool + Linear, fused as row-mean of base_s + bias.
            # Padded feat columns are exact zeros, so the Rpad-sum equals the R-sum.
            v2s_ref[b, :] = jnp.sum(base_s, axis=-1) * inv_R + bias

    return kernel


def gemnet_forward(feat, w2v_att, W_param, wv, bv, *, training=True):
    """GEMNet forward starting from the backbone feature map.

    feat:    [B, C, W, H] f32   backbone features
    w2v_att: [A, L] f32         attribute word embeddings
    W_param: [L, C] f32         self.W
    wv:      [C, A] f32         self.V linear weight, pre-transposed to (in, out)
    bv:      [1, A] f32         self.V linear bias
    Returns v2s (eval) or (v2s, atten_v2s, atten_map, query) (training).
    """
    B, C, Wd, Hd = feat.shape
    R = Wd * Hd
    A = w2v_att.shape[0]
    Rpad = ((R + 127) // 128) * 128

    # Hoisted batch-invariant query projection (returned in f32, like the module).
    query = jnp.dot(w2v_att, W_param)                                   # [A, C] f32

    # Fused LHS for the single MXU pass: query rows on top, V weight rows below.
    lhs = jnp.concatenate([query, wv.T], axis=0).astype(jnp.bfloat16)   # [2A, C] bf16
    bv2 = jnp.asarray(bv, jnp.float32).reshape(1, A)

    # feat -> [B, C, Rpad] bf16, spatial axis zero-padded to a 128 multiple so the
    # DMA rows and the atten_map stores are lane-dense.
    feat_r = feat.reshape(B, C, R).astype(jnp.bfloat16)
    if Rpad != R:
        feat_r = jnp.pad(feat_r, ((0, 0), (0, 0), (0, Rpad - R)))

    # Batch several images per grid step.
    Bt = 8 if B >= 8 else B
    Bpad = ((B + Bt - 1) // Bt) * Bt
    nblk = Bpad // Bt
    if Bpad != B:
        feat_r = jnp.pad(feat_r, ((0, Bpad - B), (0, 0), (0, 0)))

    # VMEM budget: double-buffered blocks + fused LHS, with headroom.
    feat_blk = Bt * C * Rpad * 2
    amap_blk = Bt * A * Rpad * 4
    small_blk = 2 * Bt * A * 4
    lhs_blk = 2 * A * C * 2 + A * 4
    est = 2 * (feat_blk + amap_blk + small_blk + lhs_blk) + (2 << 20)
    vmem_limit = int(min(max(est, 16 << 20), 64 << 20))

    # v7x: split the batch-block axis across the two TensorCores.
    dev_kind = ""
    try:
        dev_kind = jax.devices()[0].device_kind.lower()
    except Exception:
        pass
    if "v7" in dev_kind and nblk > 1:
        dim_sem = (pltpu.CORE_PARALLEL,)
    else:
        dim_sem = (pltpu.PARALLEL,)

    kernel = _make_gemnet_kernel(A, R, Rpad, Bt)
    const = lambda shape: pl.BlockSpec(shape, lambda i: (0,) * len(shape))

    v2s, atten_v2s, atten_map = pl.pallas_call(
        kernel,
        out_shape=(
            jax.ShapeDtypeStruct((Bpad, A), jnp.float32),          # v2s
            jax.ShapeDtypeStruct((Bpad, A), jnp.float32),          # atten_v2s
            jax.ShapeDtypeStruct((Bpad, A, Rpad), jnp.float32),    # atten_map (padded spatial)
        ),
        grid_spec=pltpu.PrefetchScalarGridSpec(
            num_scalar_prefetch=0,
            grid=(nblk,),
            in_specs=[
                pl.BlockSpec((Bt, C, Rpad), lambda i: (i, 0, 0)),  # feat block (per batch-block)
                const((2 * A, C)),                                 # fused LHS (resident)
                const((1, A)),                                     # V bias
            ],
            out_specs=(
                pl.BlockSpec((Bt, A), lambda i: (i, 0)),
                pl.BlockSpec((Bt, A), lambda i: (i, 0)),
                pl.BlockSpec((Bt, A, Rpad), lambda i: (i, 0, 0)),
            ),
        ),
        compiler_params=pltpu.CompilerParams(
            dimension_semantics=dim_sem,
            vmem_limit_bytes=vmem_limit,
        ),
    )(feat_r, lhs, bv2)

    v2s = v2s[:B]
    if not training:
        return v2s
    atten_v2s = atten_v2s[:B]
    atten_map = atten_map[:B, :, :R].reshape(B, A, Wd, Hd)
    return v2s, atten_v2s, atten_map, query


def gemnet_forward_ref(feat, w2v_att, W_param, wv, bv):
    """Pure-JAX f32 reference mirroring GEMNet.forward (minus the backbone)."""
    B, C, Wd, Hd = feat.shape
    # base_module: avg_pool2d(kernel=(W,H)) + Linear(C, A)
    global_feat = jnp.mean(feat, axis=(2, 3))                            # [B, C]
    v2s = global_feat @ wv + bv                                          # [B, A]
    # attentionModule
    x = feat.reshape(B, C, Wd * Hd)
    query = jnp.einsum("lw,wv->lv", w2v_att, W_param)                    # [A, C]
    amap = jnp.einsum("lv,bvr->blr", query, x)                           # [B, A, R]
    amap = jax.nn.softmax(amap, axis=-1)
    amap = amap.reshape(B, -1, Wd, Hd)
    atten_v2s = jnp.max(amap, axis=(2, 3))                               # max_pool2d(kernel=(W,H))
    return v2s, atten_v2s, amap, query


if __name__ == "__main__":
    # Small shapes consistent with the module's forward (post-backbone).
    B, C, Wd, Hd = 2, 64, 4, 4      # batch, feat_channel, feat_w, feat_h
    A, L = 16, 32                   # attritube_num, w2v embedding length

    key = jax.random.PRNGKey(0)
    kf, kw, kW, kv, kb = jax.random.split(key, 5)
    feat = jax.random.normal(kf, (B, C, Wd, Hd), dtype=jnp.float32)
    w2v_att = jax.random.normal(kw, (A, L), dtype=jnp.float32)
    # Scaled weights so the softmax logits stay O(1) in the test.
    W_param = (0.02 * jax.random.normal(kW, (L, C))).astype(jnp.float32)
    wv = (0.05 * jax.random.normal(kv, (C, A))).astype(jnp.float32)   # V weight (in, out)
    bv = (0.05 * jax.random.normal(kb, (1, A))).astype(jnp.float32)   # V bias

    v2s, atten_v2s, atten_map, query = jax.block_until_ready(
        gemnet_forward(feat, w2v_att, W_param, wv, bv, training=True))

    v2s_r, atten_v2s_r, atten_map_r, query_r = jax.block_until_ready(
        gemnet_forward_ref(feat, w2v_att, W_param, wv, bv))

    assert v2s.shape == (B, A)
    assert atten_v2s.shape == (B, A)
    assert atten_map.shape == (B, A, Wd, Hd)
    assert query.shape == (A, C)

    # query is computed in f32 exactly like the reference.
    np.testing.assert_allclose(np.asarray(query), np.asarray(query_r),
                               rtol=1e-4, atol=1e-4)
    # The kernel uses bf16 MXU operands (f32 accumulation), so tolerances
    # account for bf16 quantization of feat / query / V weight.
    np.testing.assert_allclose(np.asarray(v2s), np.asarray(v2s_r),
                               rtol=1e-2, atol=1e-2)
    np.testing.assert_allclose(np.asarray(atten_map), np.asarray(atten_map_r),
                               rtol=2e-2, atol=2e-2)
    np.testing.assert_allclose(np.asarray(atten_v2s), np.asarray(atten_v2s_r),
                               rtol=2e-2, atol=2e-2)

    # Eval path returns v2s only.
    v2s_eval = jax.block_until_ready(
        gemnet_forward(feat, w2v_att, W_param, wv, bv, training=False))
    np.testing.assert_allclose(np.asarray(v2s_eval), np.asarray(v2s_r),
                               rtol=1e-2, atol=1e-2)

    print("KERNEL_OK")
</pallas_src>

<mosaic_0001>
module attributes {stable_mosaic.version = 11 : i64} {
  func.func @kernel(%arg0: i32, %arg1: memref<2x64x128xbf16, #tpu.memory_space<vmem>>, %arg2: memref<32x64xbf16, #tpu.memory_space<vmem>>, %arg3: memref<1x16xf32, #tpu.memory_space<vmem>>, %arg4: memref<2x16xf32, #tpu.memory_space<vmem>>, %arg5: memref<2x16xf32, #tpu.memory_space<vmem>>, %arg6: memref<2x16x128xf32, #tpu.memory_space<vmem>>) attributes {dimension_semantics = [#tpu.dimension_semantics<parallel>], iteration_bounds = array<i64: 1>, scalar_prefetch = 0 : i64, scratch_operands = 0 : i64, tpu.core_type = #tpu.core_type<tc>, window_params = [{transform_indices = @transform_0, window_bounds = array<i64: 2, 64, 128>}, {pipeline_mode = #tpu.pipeline_mode<synchronous>, transform_indices = @transform_1, window_bounds = array<i64: 32, 64>}, {pipeline_mode = #tpu.pipeline_mode<synchronous>, transform_indices = @transform_2, window_bounds = array<i64: 1, 16>}, {transform_indices = @transform_3, window_bounds = array<i64: 2, 16>}, {transform_indices = @transform_4, window_bounds = array<i64: 2, 16>}, {transform_indices = @transform_5, window_bounds = array<i64: 2, 16, 128>}]} {
    %c0 = arith.constant 0 : index
    %c0_0 = arith.constant 0 : index
    %0 = vector.load %arg2[%c0, %c0_0] : memref<32x64xbf16, #tpu.memory_space<vmem>>, vector<32x64xbf16>
    %c0_1 = arith.constant 0 : index
    %c0_2 = arith.constant 0 : index
    %1 = vector.load %arg3[%c0_1, %c0_2] : memref<1x16xf32, #tpu.memory_space<vmem>>, vector<1x16xf32>
    %2 = vector.shape_cast %1 : vector<1x16xf32> to vector<16xf32>
    %3 = tpu.iota {dimensions = array<i32: 1>} : vector<1x128xi32>
    %c16_i32 = arith.constant 16 : i32
    %4 = vector.broadcast %c16_i32 : i32 to vector<1x128xi32>
    %5 = arith.cmpi slt, %3, %4 : vector<1x128xi32>
    %c0_3 = arith.constant 0 : index
    %c0_4 = arith.constant 0 : index
    %c0_5 = arith.constant 0 : index
    %6 = vector.load %arg1[%c0_3, %c0_4, %c0_5] : memref<2x64x128xbf16, #tpu.memory_space<vmem>>, vector<1x64x128xbf16>
    %7 = vector.shape_cast %6 : vector<1x64x128xbf16> to vector<64x128xbf16>
    %cst = arith.constant dense<0.000000e+00> : vector<32x128xf32>
    %8 = tpu.matmul %0, %7, %cst {dimension_numbers = #tpu.dot_dimension_numbers<[1], [0], [0], [1], [0, 0, 1, 1], [], []>} : vector<32x64xbf16>, vector<64x128xbf16>, vector<32x128xf32> -> vector<32x128xf32>
    %9 = vector.extract_strided_slice %8 {offsets = [0, 0], sizes = [16, 128], strides = [1, 1]} : vector<32x128xf32> to vector<16x128xf32>
    %10 = vector.extract_strided_slice %8 {offsets = [16, 0], sizes = [16, 128], strides = [1, 1]} : vector<32x128xf32> to vector<16x128xf32>
    %cst_6 = arith.constant 0xFF800000 : f32
    %11 = vector.shape_cast %5 : vector<1x128xi1> to vector<1x128xi1>
    %12 = vector.broadcast %11 : vector<1x128xi1> to vector<16x128xi1>
    %13 = vector.broadcast %cst_6 : f32 to vector<16x128xf32>
    %14 = arith.select %12, %9, %13 : vector<16x128xi1>, vector<16x128xf32>
    %cst_7 = arith.constant dense<0xFF800000> : vector<16xf32>
    %15 = vector.multi_reduction <maximumf>, %14, %cst_7 [1] : vector<16x128xf32> to vector<16xf32>
    %16 = vector.shape_cast %15 : vector<16xf32> to vector<16x1xf32>
    %17 = vector.broadcast %16 : vector<16x1xf32> to vector<16x128xf32>
    %18 = arith.subf %14, %17 : vector<16x128xf32>
    %19 = math.exp %18 : vector<16x128xf32>
    %cst_8 = arith.constant dense<0.000000e+00> : vector<16xf32>
    %20 = vector.multi_reduction <add>, %19, %cst_8 [1] : vector<16x128xf32> to vector<16xf32>
    %21 = vector.shape_cast %20 : vector<16xf32> to vector<16x1xf32>
    %cst_9 = arith.constant 1.000000e+00 : f32
    %22 = vector.broadcast %cst_9 : f32 to vector<16x1xf32>
    %23 = arith.divf %22, %21 : vector<16x1xf32>
    %24 = vector.broadcast %23 : vector<16x1xf32> to vector<16x128xf32>
    %25 = arith.mulf %19, %24 : vector<16x128xf32>
    %c0_10 = arith.constant 0 : index
    %c0_11 = arith.constant 0 : index
    %c0_12 = arith.constant 0 : index
    %26 = vector.load %arg6[%c0_10, %c0_11, %c0_12] : memref<2x16x128xf32, #tpu.memory_space<vmem>>, vector<1x16x128xf32>
    %27 = vector.shape_cast %26 : vector<1x16x128xf32> to vector<16x128xf32>
    %28 = vector.shape_cast %25 : vector<16x128xf32> to vector<1x16x128xf32>
    tpu.vector_store %arg6[%c0_10, %c0_11, %c0_12], %28 {strides = array<i32>} : memref<2x16x128xf32, #tpu.memory_space<vmem>>, vector<1x16x128xf32>,
    %29 = vector.shape_cast %23 : vector<16x1xf32> to vector<16xf32>
    %c0_13 = arith.constant 0 : index
    %c0_14 = arith.constant 0 : index
    %30 = vector.load %arg5[%c0_13, %c0_14] : memref<2x16xf32, #tpu.memory_space<vmem>>, vector<1x16xf32>
    %31 = vector.shape_cast %30 : vector<1x16xf32> to vector<16xf32>
    %32 = vector.shape_cast %29 : vector<16xf32> to vector<1x16xf32>
    tpu.vector_store %arg5[%c0_13, %c0_14], %32 {strides = array<i32>} : memref<2x16xf32, #tpu.memory_space<vmem>>, vector<1x16xf32>,
    %cst_15 = arith.constant dense<0.000000e+00> : vector<16xf32>
    %33 = vector.multi_reduction <add>, %10, %cst_15 [1] : vector<16x128xf32> to vector<16xf32>
    %cst_16 = arith.constant 6.250000e-02 : f32
    %34 = vector.broadcast %cst_16 : f32 to vector<16xf32>
    %35 = arith.mulf %33, %34 : vector<16xf32>
    %36 = arith.addf %35, %2 : vector<16xf32>
    %c0_17 = arith.constant 0 : index
    %c0_18 = arith.constant 0 : index
    %37 = vector.load %arg4[%c0_17, %c0_18] : memref<2x16xf32, #tpu.memory_space<vmem>>, vector<1x16xf32>
    %38 = vector.shape_cast %37 : vector<1x16xf32> to vector<16xf32>
    %39 = vector.shape_cast %36 : vector<16xf32> to vector<1x16xf32>
    tpu.vector_store %arg4[%c0_17, %c0_18], %39 {strides = array<i32>} : memref<2x16xf32, #tpu.memory_space<vmem>>, vector<1x16xf32>,
    %c1 = arith.constant 1 : index
    %c0_19 = arith.constant 0 : index
    %c0_20 = arith.constant 0 : index
    %40 = vector.load %arg1[%c1, %c0_19, %c0_20] : memref<2x64x128xbf16, #tpu.memory_space<vmem>>, vector<1x64x128xbf16>
    %41 = vector.shape_cast %40 : vector<1x64x128xbf16> to vector<64x128xbf16>
    %cst_21 = arith.constant dense<0.000000e+00> : vector<32x128xf32>
    %42 = tpu.matmul %0, %41, %cst_21 {dimension_numbers = #tpu.dot_dimension_numbers<[1], [0], [0], [1], [0, 0, 1, 1], [], []>} : vector<32x64xbf16>, vector<64x128xbf16>, vector<32x128xf32> -> vector<32x128xf32>
    %43 = vector.extract_strided_slice %42 {offsets = [0, 0], sizes = [16, 128], strides = [1, 1]} : vector<32x128xf32> to vector<16x128xf32>
    %44 = vector.extract_strided_slice %42 {offsets = [16, 0], sizes = [16, 128], strides = [1, 1]} : vector<32x128xf32> to vector<16x128xf32>
    %cst_22 = arith.constant 0xFF800000 : f32
    %45 = vector.shape_cast %5 : vector<1x128xi1> to vector<1x128xi1>
    %46 = vector.broadcast %45 : vector<1x128xi1> to vector<16x128xi1>
    %47 = vector.broadcast %cst_22 : f32 to vector<16x128xf32>
    %48 = arith.select %46, %43, %47 : vector<16x128xi1>, vector<16x128xf32>
    %cst_23 = arith.constant dense<0xFF800000> : vector<16xf32>
    %49 = vector.multi_reduction <maximumf>, %48, %cst_23 [1] : vector<16x128xf32> to vector<16xf32>
    %50 = vector.shape_cast %49 : vector<16xf32> to vector<16x1xf32>
    %51 = vector.broadcast %50 : vector<16x1xf32> to vector<16x128xf32>
    %52 = arith.subf %48, %51 : vector<16x128xf32>
    %53 = math.exp %52 : vector<16x128xf32>
    %cst_24 = arith.constant dense<0.000000e+00> : vector<16xf32>
    %54 = vector.multi_reduction <add>, %53, %cst_24 [1] : vector<16x128xf32> to vector<16xf32>
    %55 = vector.shape_cast %54 : vector<16xf32> to vector<16x1xf32>
    %cst_25 = arith.constant 1.000000e+00 : f32
    %56 = vector.broadcast %cst_25 : f32 to vector<16x1xf32>
    %57 = arith.divf %56, %55 : vector<16x1xf32>
    %58 = vector.broadcast %57 : vector<16x1xf32> to vector<16x128xf32>
    %59 = arith.mulf %53, %58 : vector<16x128xf32>
    %c1_26 = arith.constant 1 : index
    %c0_27 = arith.constant 0 : index
    %c0_28 = arith.constant 0 : index
    %60 = vector.load %arg6[%c1_26, %c0_27, %c0_28] : memref<2x16x128xf32, #tpu.memory_space<vmem>>, vector<1x16x128xf32>
    %61 = vector.shape_cast %60 : vector<1x16x128xf32> to vector<16x128xf32>
    %62 = vector.shape_cast %59 : vector<16x128xf32> to vector<1x16x128xf32>
    tpu.vector_store %arg6[%c1_26, %c0_27, %c0_28], %62 {strides = array<i32>} : memref<2x16x128xf32, #tpu.memory_space<vmem>>, vector<1x16x128xf32>,
    %63 = vector.shape_cast %57 : vector<16x1xf32> to vector<16xf32>
    %c1_29 = arith.constant 1 : index
    %c0_30 = arith.constant 0 : index
    %64 = vector.load %arg5[%c1_29, %c0_30] : memref<2x16xf32, #tpu.memory_space<vmem>>, vector<1x16xf32>
    %65 = vector.shape_cast %64 : vector<1x16xf32> to vector<16xf32>
    %66 = vector.shape_cast %63 : vector<16xf32> to vector<1x16xf32>
    tpu.vector_store %arg5[%c1_29, %c0_30], %66 {strides = array<i32>} : memref<2x16xf32, #tpu.memory_space<vmem>>, vector<1x16xf32>,
    %cst_31 = arith.constant dense<0.000000e+00> : vector<16xf32>
    %67 = vector.multi_reduction <add>, %44, %cst_31 [1] : vector<16x128xf32> to vector<16xf32>
    %cst_32 = arith.constant 6.250000e-02 : f32
    %68 = vector.broadcast %cst_32 : f32 to vector<16xf32>
    %69 = arith.mulf %67, %68 : vector<16xf32>
    %70 = arith.addf %69, %2 : vector<16xf32>
    %c1_33 = arith.constant 1 : index
    %c0_34 = arith.constant 0 : index
    %71 = vector.load %arg4[%c1_33, %c0_34] : memref<2x16xf32, #tpu.memory_space<vmem>>, vector<1x16xf32>
    %72 = vector.shape_cast %71 : vector<1x16xf32> to vector<16xf32>
    %73 = vector.shape_cast %70 : vector<16xf32> to vector<1x16xf32>
    tpu.vector_store %arg4[%c1_33, %c0_34], %73 {strides = array<i32>} : memref<2x16xf32, #tpu.memory_space<vmem>>, vector<1x16xf32>,
    return
  }
  func.func @transform_0(%arg0: i32) -> (i32, i32, i32) {
    %c0_i32 = arith.constant 0 : i32
    %c0_i32_0 = arith.constant 0 : i32
    %c0_i32_1 = arith.constant 0 : i32
    return %arg0, %c0_i32, %c0_i32_0 : i32, i32, i32
  }
  func.func @transform_1(%arg0: i32) -> (i32, i32) {
    %c0_i32 = arith.constant 0 : i32
    %c0_i32_0 = arith.constant 0 : i32
    %c0_i32_1 = arith.constant 0 : i32
    return %c0_i32, %c0_i32_0 : i32, i32
  }
  func.func @transform_2(%arg0: i32) -> (i32, i32) {
    %c0_i32 = arith.constant 0 : i32
    %c0_i32_0 = arith.constant 0 : i32
    %c0_i32_1 = arith.constant 0 : i32
    return %c0_i32, %c0_i32_0 : i32, i32
  }
  func.func @transform_3(%arg0: i32) -> (i32, i32) {
    %c0_i32 = arith.constant 0 : i32
    %c0_i32_0 = arith.constant 0 : i32
    return %arg0, %c0_i32 : i32, i32
  }
  func.func @transform_4(%arg0: i32) -> (i32, i32) {
    %c0_i32 = arith.constant 0 : i32
    %c0_i32_0 = arith.constant 0 : i32
    return %arg0, %c0_i32 : i32, i32
  }
  func.func @transform_5(%arg0: i32) -> (i32, i32, i32) {
    %c0_i32 = arith.constant 0 : i32
    %c0_i32_0 = arith.constant 0 : i32
    %c0_i32_1 = arith.constant 0 : i32
    return %arg0, %c0_i32, %c0_i32_0 : i32, i32, i32
  }
}

</mosaic_0001>

<bundles_post_ra>
// kernel: tpu_custom_call.1
= control target key start
LH: loop header
LB: loop body
LE: loop exit
PB: predicated region body
PF: predicated region fallthrough
CT: control target
= control target key end

     0   :  { %11 = vsyncpa [#allocation3], 0  ;;  %s734_s0 = inlined_call_operand.hbm [shape: bf16[2,64,128], index: 0, kind: input, shape index: {}]   ;;  %s735_s1 = inlined_call_operand.hbm [shape: bf16[32,64], index: 1, kind: input, shape index: {}]   ;;  %s736_s2 = inlined_call_operand.vmem [shape: f32[1,16], index: 2, kind: input, shape index: {}]   ;;  %s737_s3 = inlined_call_operand.hbm [shape: f32[2,16], index: 3, kind: output, shape index: {0}]   ;;  %s738_s4 = inlined_call_operand.hbm [shape: f32[2,16], index: 4, kind: output, shape index: {1}]   ;;  %s739_s5 = inlined_call_operand.hbm [shape: f32[2,16,128], index: 5, kind: output, shape index: {2}]  }
   0x1   :  { %12 = vsyncpa [#allocation6], 0 }
   0x2   :  { %13 = vsyncpa [#allocation4], 0 }
   0x3   :  { %14 = vsyncpa [#allocation9], 0  ;;  %s19_s20 = sshll.u32 %s734_s0, 4  ;;  %s630_s21 = smov [#allocation2]   ;;  %s20_s20 = int_to_ptr.hbm [resolvable:$true] %s19_s20 }
   0x4   :  { %s21_s22 = sshll.u32 %s630_s21, 4  ;;  %s32_s25 = sshll.u32 %s735_s1, 4  ;;  %s22_s22 = int_to_ptr.vmem [resolvable:$true] %s21_s22  ;;  %s33_s25 = int_to_ptr.hbm [resolvable:$true] %s32_s25 }
   0x5   :  { %s631_s26 = smov 64   ;;  %s632_s27 = smov 4  }
   0x6   :  { %27 = dma.hbm_to_vmem [thread:$0]  %s20_s20, 1024, %s22_s22, [#allocation3], %s631_s26, %s631_s26, %s632_s27  }
   0x7   :  { %s633_s28 = smov [#allocation5]  }
   0x8   :  { %s34_s29 = sshll.u32 %s633_s28, 4  ;;  %s35_s29 = int_to_ptr.vmem [resolvable:$true] %s34_s29 }
   0x9   :  { %40 = dma.hbm_to_vmem [thread:$0]  %s33_s25, 256, %s35_s29, [#allocation6], %s631_s26, %s631_s26, %s632_s27  }
   0xa   :  { %622 = dma.done.wait [#allocation3], 1024  }
   0xb   :  { %623 = vsyncadd [#allocation3], 4294966272 }
   0xc   :  { %624 = dma.done.wait [#allocation6], 256  }
   0xd   :  { %625 = vsyncadd [#allocation6], 4294967040  ;;  %v458_v0 = vld [vmem:[#allocation2 + $0x18] sm:$0xff]  ;;  %v457_v2 = vld [vmem:[#allocation2 + $0x10] sm:$0xff]  ;;  %vm102_vm0 = vcmask 523264   ;;  %v57_v10 = vlaneseq  ;;  %v634_v32 = vmov 0  }
   0xe   :  { %v462_v1 = vld [vmem:[#allocation2 + $0x38] sm:$0xff]  ;;  %113 = vmatpush.bf16.msra.mxu0 %v458_v0  ;;  %463 = vmatpush.bf16.msra.mxu2 %v458_v0  ;;  %v461_v3 = vld [vmem:[#allocation2 + $0x30] sm:$0xff]  ;;  %v456_v4 = vld [vmem:[#allocation2 + $0x8] sm:$0xff]  ;;  %vm185_vm14 = vcmask 130112   ;;  %vm188_vm15 = vcmask 122880   ;;  %s376_s8 = sshll.u32 %s738_s4, 4  ;;  %s377_s8 = int_to_ptr.hbm [resolvable:$true] %s376_s8 }
   0xf   :  { %264 = vmatpush.bf16.msra.mxu1 %v462_v1  ;;  %467 = vmatpush.bf16.msra.mxu3 %v462_v1  ;;  %v460_v5 = vld [vmem:[#allocation2 + $0x28] sm:$0xff]  ;;  %v455_v6 = vld [vmem:[#allocation2] sm:$0xff]  ;;  %v199_v11 = vshrl.u32 %v57_v10, 7  ;;  %v676_v13 = vand.u32 127, %v57_v10  ;;  %s636_s9 = smov [#allocation10]   ;;  %s386_s13 = sshll.u32 %s739_s5, 4  ;;  %s387_s13 = int_to_ptr.hbm [resolvable:$true] %s386_s13 }
  0x10   :  { %v459_v7 = vld [vmem:[#allocation2 + $0x20] sm:$0xff]  ;;  %v454_v9 = vld [vmem:[#allocation5 + $0x8] sm:$0xff]  ;;  %483 = vset.pattern.permute.xlu1 %v634_v32  ;;  %s384_s10 = sshll.u32 %s636_s9, 4  ;;  %s637_s4 = smov 128   ;;  %s385_s10 = int_to_ptr.vmem [resolvable:$true] %s384_s10 }
  0x11   :  { %v453_v8 = vld [vmem:[#allocation5] sm:$0xff]  ;;  %v206_v12 = vadd.s32 8, %v199_v11  ;;  %481 = vset.pattern.permute.xlu2 %v199_v11  ;;  %vm59_vm1 = vcmp.lt.s32.totalorder %v676_v13, 16  ;;  %s638_s5 = smov 8   ;;  %s639_s14 = smov [#allocation7]  }
  0x12   :  { %114 = vmatpush.bf16.msra.mxu0 %v457_v2  ;;  %464 = vmatpush.bf16.msra.mxu2 %v457_v2  ;;  %v485_v26 = vld [vmem:[%s736_s2] ss:$0 sm:$0xff]  ;;  %s635_s2 = smov [#allocation8]   ;;  %s363_s15 = sshll.u32 %s639_s14, 4  ;;  %s364_s15 = int_to_ptr.vmem [resolvable:$true] %s363_s15 }
  0x13   :  { %265 = vmatpush.bf16.msra.mxu1 %v461_v3  ;;  %468 = vmatpush.bf16.msra.mxu3 %v461_v3  ;;  %s374_s30 = sshll.u32 %s635_s2, 4  ;;  %s365_s18 = sshll.u32 %s737_s3, 4  ;;  %s375_s30 = int_to_ptr.vmem [resolvable:$true] %s374_s30  ;;  %s366_s18 = int_to_ptr.hbm [resolvable:$true] %s365_s18 }
  0x14   :  { %482 = vset.pattern.permute.xlu0 %v206_v12 }
  0x16   :  { %115 = vmatpush.bf16.msra.mxu0 %v456_v4  ;;  %465 = vmatpush.bf16.msra.mxu2 %v456_v4 }
  0x17   :  { %266 = vmatpush.bf16.msra.mxu1 %v460_v5  ;;  %469 = vmatpush.bf16.msra.mxu3 %v460_v5 }
  0x1a   :  { %116 = vmatpush.bf16.msra.mxu0 %v455_v6  ;;  %466 = vmatpush.bf16.msra.mxu2 %v455_v6 }
  0x1b   :  { %267 = vmatpush.bf16.msra.mxu1 %v459_v7  ;;  %470 = vmatpush.bf16.msra.mxu3 %v459_v7 }
  0x1d   :  { %433 = vmatmul.msk.bf16.vlgmr.msra.gmra.mxu0 %vm102_vm0, %v453_v8  ;;  %434 = vmatmul.msk.bf16.vlgmr.msra.gmra.mxu2 %vm102_vm0, %v454_v9 }
  0x1e   :  { %451 = vmatmul.msk.bf16.vlgmr.msra.gmra.mxu1 %vm102_vm0, %v453_v8  ;;  %452 = vmatmul.msk.bf16.vlgmr.msra.gmra.mxu3 %vm102_vm0, %v454_v9 }
  0x9a   :  { %v118_v14 = vpop.f32.mrf.mxu0 }
  0x9b   :  { %v269_v15 = vpop.f32.mrf.mxu1  ;;  %v130_v16 = vsel %vm59_vm1, %v118_v14, -inf }
  0x9c   :  { %v279_v17 = vsel %vm59_vm1, %v269_v15, -inf  ;;  %132 = vmax.xlane.f32.xlu0 %v130_v16 }
  0x9d   :  { %281 = vmax.xlane.f32.xlu1 %v279_v17 }
  0xa0   :  { %v123_v18 = vpop.f32.mrf.mxu2 }
  0xa1   :  { %190 = vadd.xlane.f32.xlu2 %v123_v18  ;;  %v274_v19 = vpop.f32.mrf.mxu3 }
  0xa2   :  { %v120_v22 = vpop.f32.mrf.mxu0 }
  0xa3   :  { %v271_v20 = vpop.f32.mrf.mxu1  ;;  %v131_v24 = vsel %vm59_vm1, %v120_v22, -inf }
  0xa4   :  { %v280_v21 = vsel %vm59_vm1, %v271_v20, -inf  ;;  %337 = vadd.xlane.f32.xlu0 %v274_v19 }
  0xa5   :  { %283 = vmax.xlane.f32.xlu1 %v280_v21 }
  0xa8   :  { %v125_v23 = vpop.f32.mrf.mxu2 }
  0xa9   :  { %192 = vadd.xlane.f32.xlu2 %v125_v23  ;;  %v276_v25 = vpop.f32.mrf.mxu3 }
  0xac   :  { %134 = vmax.xlane.f32.xlu0 %v131_v24 }
  0xad   :  { %339 = vadd.xlane.f32.xlu1 %v276_v25 }
  0xc0   :  { %208 = vperm.xlu0 %482, %v485_v26  }
  0xc1   :  { %202 = vperm.xlu2 %481, %v485_v26   ;;  %v703_v26 = vadd.s32 4294967288, %v676_v13 }
  0xc8   :  { %484 = vset.pattern.permute.xlu0 %v634_v32 }
 0x10f   :  { %v133_v27 = vpop.xlane.xlu0 %132 }
 0x110   :  { %v282_v28 = vpop.xlane.xlu1 %281  ;;  %v136_v29 = vsub.f32 %v130_v16, %v133_v27 }
 0x111   :  { %v285_v31 = vsub.f32 %v279_v17, %v282_v28 }
 0x112   :  { %v138_v30 = vmul.f32 1.442695, %v136_v29 }
 0x113   :  { %v287_v34 = vmul.f32 1.442695, %v285_v31 }
 0x114   :  { %486 = vpow2.f32 %v138_v30  ;;  %v191_v44 = vpop.xlane.xlu2 %190 }
 0x115   :  { %488 = vpow2.f32 %v287_v34  ;;  %v194_v53 = vmul.f32 0.0625, %v191_v44 }
 0x117   :  { %v338_v33 = vpop.xlane.xlu0 %337 }
 0x118   :  { %v284_v35 = vpop.xlane.xlu1 %283  ;;  %v341_v56 = vmul.f32 0.0625, %v338_v33 }
 0x119   :  { %v286_v36 = vsub.f32 %v280_v21, %v284_v35 }
 0x11a   :  { %v487_v37 = vpop.eup %486 }
 0x11b   :  { %v289_v38 = vmul.f32 1.442695, %v286_v36  ;;  %142 = vadd.xlane.f32.xlu1 %v487_v37  ;;  %v690_v41 = vpop.eup %488 }
 0x11c   :  { %v193_v46 = vpop.xlane.xlu2 %192 }
 0x11d   :  { %490 = vpow2.f32 %v289_v38  ;;  %v195_v47 = vmul.f32 0.0625, %v193_v46 }
 0x11f   :  { %v135_v39 = vpop.xlane.xlu0 %134 }
 0x120   :  { %v137_v40 = vsub.f32 %v131_v24, %v135_v39  ;;  %v340_v50 = vpop.xlane.xlu1 %339 }
 0x121   :  { %v342_v51 = vmul.f32 0.0625, %v340_v50 }
 0x122   :  { %v140_v42 = vmul.f32 1.442695, %v137_v40 }
 0x123   :  { %v692_v43 = vpop.eup %490  ;;  %291 = vadd.xlane.f32.xlu1 %v690_v41 }
 0x124   :  { %492 = vpow2.f32 %v140_v42  ;;  %293 = vadd.xlane.f32.xlu2 %v692_v43  ;;  %v203_v54 = vpop.permute.xlu2 %202 }
 0x125   :  { %v212_v55 = vadd.f32 %v203_v54, %v194_v53  ;;  %v343_v57 = vadd.f32 %v341_v56, %v203_v54 }
 0x12a   :  { %v696_v45 = vpop.eup %492 }
 0x12b   :  { %144 = vadd.xlane.f32.xlu1 %v696_v45 }
 0x132   :  { %v209_v48 = vpop.permute.xlu0 %208 }
 0x133   :  { %v213_v49 = vadd.f32 %v209_v48, %v195_v47  ;;  %v344_v52 = vadd.f32 %v342_v51, %v209_v48 }
 0x135   :  { %220 = vperm.xlu0 %484, %v213_v49  }
 0x13d   :  { %351 = vperm.xlu0 %484, %v344_v52  }
 0x144   :  { %217 = vperm.xlu1 %483, %v212_v55  }
 0x14c   :  { %348 = vperm.xlu1 %483, %v343_v57  }
 0x18e   :  { %v143_v58 = vpop.xlane.xlu1 %142 }
 0x18f   :  { %494 = vrcp.f32 %v143_v58  ;;  %v157_v0 = vand.u32 2147483648, %v143_v58  ;;  %v155_v2 = vand.u32 2147483647, %v143_v58  ;;  %vm151_vm3 = vweird.f32 %v143_v58 }
 0x191   :  { %v158_v5 = vor.u32 1.1754944e-38, %v157_v0  ;;  %vm156_vm5 = vcmp.eq.f32.partialorder %v155_v2, 8.507059e+37 }
 0x195   :  { %v495_v59 = vpop.eup %494 }
 0x196   :  { %v147_v60 = vmul.f32 %v495_v59, %v143_v58  ;;  %v292_v61 = vpop.xlane.xlu1 %291  ;;  %vm152_vm2 = vweird.f32 %v495_v59 }
 0x197   :  { %v294_v62 = vpop.xlane.xlu2 %293  ;;  %496 = vrcp.f32 %v292_v61  ;;  %vm153_vm4 = vmor %vm151_vm3, %vm152_vm2  ;;  %v306_v16 = vand.u32 2147483648, %v292_v61  ;;  %v304_v19 = vand.u32 2147483647, %v292_v61  ;;  %vm300_vm8 = vweird.f32 %v292_v61 }
 0x198   :  { %v148_v63 = vsub.f32 1.0, %v147_v60  ;;  %498 = vrcp.f32 %v294_v62  ;;  %v321_v17 = vand.u32 2147483648, %v294_v62  ;;  %v319_v21 = vand.u32 2147483647, %v294_v62 }
 0x199   :  { %vm315_vm9 = vweird.f32 %v294_v62  ;;  %v307_v25 = vor.u32 1.1754944e-38, %v306_v16  ;;  %vm305_vm12 = vcmp.eq.f32.partialorder %v304_v19, 8.507059e+37 }
 0x19a   :  { %v149_v1 = vmul.f32 %v495_v59, %v148_v63  ;;  %v322_v27 = vor.u32 1.1754944e-38, %v321_v17  ;;  %vm320_vm13 = vcmp.eq.f32.partialorder %v319_v21, 8.507059e+37 }
 0x19c   :  { %v150_v3 = vadd.f32 %v495_v59, %v149_v1 }
 0x19d   :  { %v497_v4 = vpop.eup %496 }
 0x19e   :  { %v499_v6 = vpop.eup %498  ;;  %v154_v7 = vsel %vm153_vm4, %v495_v59, %v150_v3  ;;  %v296_v8 = vmul.f32 %v497_v4, %v292_v61  ;;  %v145_v9 = vpop.xlane.xlu1 %144  ;;  %vm301_vm6 = vweird.f32 %v497_v4 }
 0x19f   :  { %v699_v10 = vsel %vm156_vm5, %v158_v5, %v154_v7  ;;  %v311_v11 = vmul.f32 %v499_v6, %v294_v62  ;;  %500 = vrcp.f32 %v145_v9  ;;  %vm316_vm7 = vweird.f32 %v499_v6  ;;  %vm302_vm10 = vmor %vm300_vm8, %vm301_vm6 }
 0x1a0   :  { %v176_v12 = vmul.f32 %v487_v37, %v699_v10  ;;  %v297_v14 = vsub.f32 1.0, %v296_v8  ;;  %vm317_vm11 = vmor %vm315_vm9, %vm316_vm7  ;;  %v172_v37 = vand.u32 2147483648, %v145_v9  ;;  %v170_v40 = vand.u32 2147483647, %v145_v9 }
 0x1a1   :  { %v312_v15 = vsub.f32 1.0, %v311_v11  ;;  %vm166_vm1 = vweird.f32 %v145_v9  ;;  %v182_v47 = vperm.slane %v699_v10, %v676_v13 }
 0x1a2   :  { %178 = vst [vmem:[#allocation10] sm:$0xff] %v176_v12  ;;  %v298_v18 = vmul.f32 %v497_v4, %v297_v14  ;;  %vm171_vm3 = vcmp.eq.f32.partialorder %v170_v40, 8.507059e+37 }
 0x1a3   :  { %v313_v20 = vmul.f32 %v499_v6, %v312_v15 }
 0x1a4   :  { %v299_v22 = vadd.f32 %v497_v4, %v298_v18 }
 0x1a5   :  { %v501_v23 = vpop.eup %500  ;;  %v314_v24 = vadd.f32 %v499_v6, %v313_v20 }
 0x1a6   :  { %v303_v28 = vsel %vm302_vm10, %v497_v4, %v299_v22  ;;  %v162_v29 = vmul.f32 %v501_v23, %v145_v9  ;;  %vm167_vm0 = vweird.f32 %v501_v23 }
 0x1a7   :  { %v318_v30 = vsel %vm317_vm11, %v499_v6, %v314_v24  ;;  %v308_v31 = vsel %vm305_vm12, %v307_v25, %v303_v28  ;;  %vm168_vm2 = vmor %vm166_vm1, %vm167_vm0  ;;  %v221_v50 = vpop.permute.xlu0 %220 }
 0x1a8   :  { %v323_v32 = vsel %vm320_vm13, %v322_v27, %v318_v30  ;;  %v325_v33 = vmul.f32 %v690_v41, %v308_v31  ;;  %v332_v34 = vperm.slane %v308_v31, %v676_v13  ;;  %v163_v35 = vsub.f32 1.0, %v162_v29 }
 0x1a9   :  { %v326_v36 = vmul.f32 %v692_v43, %v323_v32  ;;  %v333_v38 = vperm.slane %v323_v32, %v703_v26  ;;  %v173_v41 = vor.u32 1.1754944e-38, %v172_v37  ;;  %v223_v53 = vperm.slane %v221_v50, %v703_v26 }
 0x1aa   :  { %328 = vst [vmem:[#allocation10 + $0x10] sm:$0xff] %v325_v33  ;;  %v164_v39 = vmul.f32 %v501_v23, %v163_v35 }
 0x1ab   :  { %329 = vst [vmem:[#allocation10 + $0x18] sm:$0xff] %v326_v36  ;;  %v334_v42 = vsel %vm185_vm14, %v333_v38, %v332_v34 }
 0x1ac   :  { %v165_v44 = vadd.f32 %v501_v23, %v164_v39  ;;  %336 = vst.msk [vmem:[#allocation8 + $0x1] sm:$0x1] %vm188_vm15, %v334_v42 }
 0x1ae   :  { %v169_v43 = vsel %vm168_vm2, %v501_v23, %v165_v44 }
 0x1af   :  { %v174_v46 = vsel %vm171_vm3, %v173_v41, %v169_v43  ;;  %v352_v55 = vpop.permute.xlu0 %351 }
 0x1b0   :  { %v177_v48 = vmul.f32 %v696_v45, %v174_v46  ;;  %v184_v49 = vperm.slane %v174_v46, %v703_v26  ;;  %v354_v57 = vperm.slane %v352_v55, %v703_v26 }
 0x1b2   :  { %179 = vst [vmem:[#allocation10 + $0x8] sm:$0xff] %v177_v48  ;;  %v186_v51 = vsel %vm185_vm14, %v184_v49, %v182_v47 }
 0x1b3   :  { %189 = vst.msk [vmem:[#allocation8] sm:$0x1] %vm188_vm15, %v186_v51 }
 0x1b4   :  { %379 = dma.vmem_to_hbm [thread:$0]  %s375_s30, 32, %s377_s8, [#allocation9]  }
 0x1b5   :  { %392 = dma.vmem_to_hbm [thread:$0]  %s385_s10, 512, %s387_s13, [#allocation9], %s637_s4, %s637_s4, %s638_s5  }
 0x1b6   :  { %v218_v52 = vpop.permute.xlu1 %217 }
 0x1b7   :  { %v222_v45 = vperm.slane %v218_v52, %v676_v13 }
 0x1b9   :  { %v224_v54 = vsel %vm185_vm14, %v223_v53, %v222_v45 }
 0x1ba   :  { %226 = vst.msk [vmem:[#allocation7] sm:$0x1] %vm188_vm15, %v224_v54 }
 0x1be   :  { %v349_v56 = vpop.permute.xlu1 %348 }
 0x1bf   :  { %v353_v58 = vperm.slane %v349_v56, %v676_v13 }
 0x1c1   :  { %v355_v59 = vsel %vm185_vm14, %v354_v57, %v353_v58 }
 0x1c2   :  { %357 = vst.msk [vmem:[#allocation7 + $0x1] sm:$0x1] %vm188_vm15, %v355_v59 }
 0x1c3   :  { %368 = dma.vmem_to_hbm [thread:$0]  %s364_s15, 32, %s366_s18, [#allocation4]  }
 0x1c4   :  { %626 = dma.done.wait [#allocation4], 32  }
 0x1c5   :  { %627 = vsyncadd [#allocation4], 4294967264 }
 0x1c6   :  { %628 = dma.done.wait [#allocation9], 544  }
 0x1c7   :  { %629 = vsyncadd [#allocation9], 4294966752 }
 0x1c8   :  { %405 = vsyncpa [#allocation3], 1 }
 0x1c9   :  { %406 = vsyncpa [#allocation6], 1 }
 0x1ca   :  { %407 = vsyncpa [#allocation4], 1 }
 0x1cb   :  { %408 = vsyncpa [#allocation9], 1 }

</bundles_post_ra>
